<compile_context>
chip_gen: v6e
topology: v6e:2x2x1
jax: 0.10.0
libtpu: 0.0.40
codegen_flags: <defaults>
</compile_context>

<pallas_src>
import jax
import jax.numpy as jnp
from jax.experimental import pallas as pl
from jax.experimental.pallas import tpu as pltpu


# ------------------------------ tiling helpers ------------------------------

def _round_up(x, m):
    return ((x + m - 1) // m) * m


def _sublane(dtype):
    # minimal sublane multiple per dtype width (f32: 8, bf16: 16, int8/fp8: 32)
    return {4: 8, 2: 16, 1: 32}.get(jnp.dtype(dtype).itemsize, 8)


def _pick_rows(n, bytes_per_row, sublane, preferred=2048, budget=12 * 1024 * 1024):
    """Row tile for the mem-bound cat/max kernels.

    Largest sublane-multiple tile that (a) keeps the double-buffered working
    set under `budget`, (b) is <= `preferred`, and (c) leaves grid >= 2 when n
    allows (megacore).  Grids use pl.cdiv, so the tile need not divide n.
    """
    if n <= sublane:
        return n
    cap = max(budget // max(bytes_per_row, 1), sublane)
    t = min(preferred, cap, _round_up(n, sublane))
    t = max((t // sublane) * sublane, sublane)
    if t >= n:                       # split so both v7x TensorCores get work
        t = max(_round_up((n + 1) // 2, sublane), sublane)
    return t


def _lstm_rows(n, feats, hp, steps, itemsize, budget=14 * 1024 * 1024):
    """Node tile for the lstm kernel, derived from an explicit VMEM budget."""
    if n <= 8:
        return n
    io_row = 2 * (steps + 1) * feats * itemsize            # double-buffered blocks
    work_row = 4 * (30 * hp + 6 * feats + 2 * steps)       # f32 live intermediates
    weights = 2 * ((2 * feats + 2 * hp) * 8 * hp + 10 * hp) * itemsize
    avail = max(budget - weights, 2 * 1024 * 1024)
    t = max(min(512, avail // (io_row + work_row)), 8)
    for align in (256, 128, 8):                            # MXU-friendly M
        if t >= align:
            t = (t // align) * align
            break
    t = min(t, _round_up(n, 8))
    if t >= n:                                             # keep grid >= 2
        t = _round_up((n + 1) // 2, 8)
    return t


# ------------------------------ Pallas kernels ------------------------------

def _make_cat_kernel(T):
    def kernel(*refs):
        x_refs, o_ref = refs[:T], refs[T]
        # Build the full-width row in registers, one lane-dense store.
        o_ref[...] = jnp.concatenate([r[...] for r in x_refs], axis=-1)
    return kernel


def _make_max_kernel(T):
    def kernel(*refs):
        x_refs, o_ref = refs[:T], refs[T]
        acc = x_refs[0][...]
        for r in x_refs[1:]:
            acc = jnp.maximum(acc, r[...])
        o_ref[...] = acc
    return kernel


def _make_lstm_kernel(T, Hp):
    H2, H4, H6 = 2 * Hp, 4 * Hp, 6 * Hp

    def kernel(*refs):
        x_refs = refs[:T]                            # each (tn, F), feature dtype
        w_ref, b_ref, aw_ref, o_ref = refs[T:]
        tn = x_refs[0].shape[0]
        dt = x_refs[0].dtype

        # Weights stay in the feature dtype (bf16 inputs -> native bf16 MXU).
        w = w_ref[...]                               # (2F+2Hp, 8Hp) block weight
        bias = b_ref[...].astype(jnp.float32)        # (1, 8Hp)
        # Hoisted broadcast (JAX does not CSE broadcast_in_dim).
        aw = jnp.broadcast_to(aw_ref[...].astype(jnp.float32), (tn, H2))

        # Fused bidirectional recurrence: one matmul per timestep, wih folded
        # in (no hoisted projection buffer).  State layout [h_fwd | h_bwd];
        # gate columns [i_f,i_b | f_f,f_b | o_f,o_b | g_f,g_b].
        h = jnp.zeros((tn, H2), jnp.float32)
        c = jnp.zeros((tn, H2), jnp.float32)
        score_f = [None] * T
        score_b = [None] * T
        for s in range(T):                           # T small & static: unrolled
            inp = jnp.concatenate(
                [x_refs[s][...], x_refs[T - 1 - s][...], h.astype(dt)], axis=-1)
            gates = jnp.dot(inp, w, preferred_element_type=jnp.float32) + bias
            sig = jax.nn.sigmoid(gates[:, :H6])      # one sigmoid over 6Hp
            g = jnp.tanh(gates[:, H6:])              # one tanh over 2Hp
            c = sig[:, H2:H4] * c + sig[:, :H2] * g
            h = sig[:, H4:H6] * jnp.tanh(c)
            # attention score contribution: VPU multiply + row reduce
            prod = h * aw
            score_f[s] = jnp.sum(prod[:, :Hp], axis=-1, keepdims=True)
            score_b[T - 1 - s] = jnp.sum(prod[:, Hp:], axis=-1, keepdims=True)

        scores = jnp.concatenate(
            [score_f[t] + score_b[t] for t in range(T)], axis=-1)   # (tn, T)
        # att bias shifts every score equally -> no effect after softmax.
        m = jnp.max(scores, axis=-1, keepdims=True)
        e = jnp.exp(scores - m)
        alpha = e * pl.reciprocal(jnp.sum(e, axis=-1, keepdims=True), approx=True)

        out = x_refs[0][...].astype(jnp.float32) * alpha[:, 0:1]
        for t in range(1, T):
            out = out + x_refs[t][...].astype(jnp.float32) * alpha[:, t:t + 1]
        o_ref[...] = out.astype(o_ref.dtype)

    return kernel


# -------------------------------- JAX wrapper --------------------------------

class JumpingKnowledge:
    """JAX/Pallas port of dgl.nn.pytorch.utils.JumpingKnowledge."""

    def __init__(self, mode="cat", in_feats=None, num_layers=None, key=None):
        assert mode in ("cat", "max", "lstm"), mode
        self.mode = mode
        if mode != "lstm":
            return
        assert in_feats is not None, "in_feats is required for lstm mode"
        assert num_layers is not None, "num_layers is required for lstm mode"
        self.in_feats = int(in_feats)
        self.num_layers = int(num_layers)
        H = self.num_layers * self.in_feats // 2
        self.hidden = H
        key = jax.random.PRNGKey(42) if key is None else key
        ks = jax.random.split(key, 10)
        k = 1.0 / float(H) ** 0.5
        Fi = self.in_feats

        def u(kk, shape, scale):
            return jax.random.uniform(kk, shape, jnp.float32, -scale, scale)

        # PyTorch-format nn.LSTM params (gate row order i, f, g, o); kept for
        # the pure-JAX reference.
        wih_f = u(ks[0], (4 * H, Fi), k); whh_f = u(ks[1], (4 * H, H), k)
        bih_f = u(ks[2], (4 * H,), k);    bhh_f = u(ks[3], (4 * H,), k)
        wih_b = u(ks[4], (4 * H, Fi), k); whh_b = u(ks[5], (4 * H, H), k)
        bih_b = u(ks[6], (4 * H,), k);    bhh_b = u(ks[7], (4 * H,), k)
        ka = 1.0 / (2 * H) ** 0.5
        att_w = u(ks[8], (1, 2 * H), ka)
        att_b = u(ks[9], (1,), ka)
        self._torch_params = dict(
            wih_f=wih_f, whh_f=whh_f, b_f=bih_f + bhh_f,
            wih_b=wih_b, whh_b=whh_b, b_b=bih_b + bhh_b,
            att_w=att_w, att_b=att_b)

        # ---- kernel-format packing ---------------------------------------
        # Pad hidden to a multiple of 64 so every gate-slice boundary
        # (multiples of 2*Hp) is 128-lane aligned; padded units keep
        # h = c = 0 and zero attention weight, so the pad is exact.
        Hp = _round_up(max(H, 8), 64)
        self.hp = Hp

        def gate_blocks(w):
            # torch (4H, X) rows [i, f, g, o] -> (X, 4, Hp) gate order [i, f, o, g]
            blk = jnp.stack(
                [w[:H].T, w[H:2 * H].T, w[3 * H:].T, w[2 * H:3 * H].T], axis=1)
            return jnp.pad(blk, ((0, 0), (0, 0), (0, Hp - H)))

        def bias_blocks(b):
            blk = jnp.stack([b[:H], b[H:2 * H], b[3 * H:], b[2 * H:3 * H]], axis=0)
            return jnp.pad(blk, ((0, 0), (0, Hp - H)))

        def place(blk, d):
            # (X, 4, Hp) -> (X, 8Hp) hitting only direction d's gate columns.
            full = jnp.zeros((blk.shape[0], 4, 2, Hp), blk.dtype)
            return full.at[:, :, d, :].set(blk).reshape(blk.shape[0], 8 * Hp)

        ih_f, ih_b = gate_blocks(wih_f), gate_blocks(wih_b)          # (Fi, 4, Hp)
        hh_f = jnp.pad(gate_blocks(whh_f), ((0, Hp - H), (0, 0), (0, 0)))
        hh_b = jnp.pad(gate_blocks(whh_b), ((0, Hp - H), (0, 0), (0, 0)))
        # Fused block weight: rows [x_f | x_b | h_f | h_b],
        # cols [i_f,i_b | f_f,f_b | o_f,o_b | g_f,g_b].
        self.w = jnp.concatenate(
            [place(ih_f, 0), place(ih_b, 1), place(hh_f, 0), place(hh_b, 1)],
            axis=0)                                                  # (2Fi+2Hp, 8Hp)
        self.bias = jnp.stack(
            [bias_blocks(bih_f + bhh_f), bias_blocks(bih_b + bhh_b)],
            axis=1).reshape(1, 8 * Hp)
        aw_fwd = jnp.pad(att_w[0, :H], (0, Hp - H))
        aw_bwd = jnp.pad(att_w[0, H:], (0, Hp - H))
        self.att_w = jnp.concatenate([aw_fwd, aw_bwd]).reshape(1, 2 * Hp)
        # att_b intentionally not packed: softmax is shift-invariant.

    # ---------------------------------- cat ----------------------------------
    def _cat(self, feat_list):
        T = len(feat_list)
        N, Fi = feat_list[0].shape
        dt = feat_list[0].dtype
        item = jnp.dtype(dt).itemsize
        tn = _pick_rows(N, 4 * T * Fi * item, _sublane(dt))
        return pl.pallas_call(
            _make_cat_kernel(T),
            out_shape=jax.ShapeDtypeStruct((N, T * Fi), dt),
            grid=(pl.cdiv(N, tn),),
            in_specs=[pl.BlockSpec((tn, Fi), lambda i: (i, 0)) for _ in range(T)],
            out_specs=pl.BlockSpec((tn, T * Fi), lambda i: (i, 0)),
            compiler_params=pltpu.CompilerParams(
                dimension_semantics=("parallel",)),
        )(*feat_list)

    # ---------------------------------- max ----------------------------------
    def _max(self, feat_list):
        T = len(feat_list)
        N, Fi = feat_list[0].shape
        dt = feat_list[0].dtype
        item = jnp.dtype(dt).itemsize
        # Lane-dense relayout (free row-major reshape) so the mem-bound max
        # uses all 128 lanes regardless of Fi.
        if (N * Fi) % 128 == 0:
            R, C = (N * Fi) // 128, 128
        else:
            R, C = N, Fi
        xs = [f.reshape(R, C) for f in feat_list]
        tr = _pick_rows(R, 2 * (T + 1) * C * item, _sublane(dt))
        out = pl.pallas_call(
            _make_max_kernel(T),
            out_shape=jax.ShapeDtypeStruct((R, C), dt),
            grid=(pl.cdiv(R, tr),),
            in_specs=[pl.BlockSpec((tr, C), lambda i: (i, 0)) for _ in range(T)],
            out_specs=pl.BlockSpec((tr, C), lambda i: (i, 0)),
            compiler_params=pltpu.CompilerParams(
                dimension_semantics=("parallel",)),
        )(*xs)
        return out.reshape(N, Fi)

    # ---------------------------------- lstm ---------------------------------
    def _lstm(self, feat_list):
        T = len(feat_list)
        N, Fi = feat_list[0].shape
        assert T == self.num_layers and Fi == self.in_feats
        Hp = self.hp
        dt = feat_list[0].dtype
        item = jnp.dtype(dt).itemsize
        tn = _lstm_rows(N, Fi, Hp, T, item)

        const = lambda i: (0, 0)
        in_specs = [pl.BlockSpec((tn, Fi), lambda i: (i, 0)) for _ in range(T)]
        in_specs += [
            pl.BlockSpec((2 * Fi + 2 * Hp, 8 * Hp), const),  # fused block weight
            pl.BlockSpec((1, 8 * Hp), const),                # fused bias
            pl.BlockSpec((1, 2 * Hp), const),                # attention weights
        ]
        return pl.pallas_call(
            _make_lstm_kernel(T, Hp),
            out_shape=jax.ShapeDtypeStruct((N, Fi), dt),
            grid=(pl.cdiv(N, tn),),
            in_specs=in_specs,
            out_specs=pl.BlockSpec((tn, Fi), lambda i: (i, 0)),
            compiler_params=pltpu.CompilerParams(
                dimension_semantics=("parallel",),
                vmem_limit_bytes=32 * 1024 * 1024),
        )(*feat_list, self.w.astype(dt), self.bias, self.att_w)

    def __call__(self, feat_list):
        if self.mode == "cat":
            return self._cat(feat_list)
        if self.mode == "max":
            return self._max(feat_list)
        return self._lstm(feat_list)


# -------------------------- pure-JAX reference (lstm) ------------------------

def _lstm_reference(feat_list, mod):
    p = mod._torch_params
    x = jnp.stack(feat_list, axis=1)                # (N, T, F)
    N, T, Fi = x.shape
    H = mod.hidden

    def run(wih, whh, b, order):
        h = jnp.zeros((N, H), jnp.float32)
        c = jnp.zeros((N, H), jnp.float32)
        hs = [None] * T
        for t in order:
            g = x[:, t, :] @ wih.T + h @ whh.T + b
            i = jax.nn.sigmoid(g[:, :H])
            f = jax.nn.sigmoid(g[:, H:2 * H])
            gg = jnp.tanh(g[:, 2 * H:3 * H])
            o = jax.nn.sigmoid(g[:, 3 * H:])
            c = f * c + i * gg
            h = o * jnp.tanh(c)
            hs[t] = h
        return hs

    hf = run(p["wih_f"], p["whh_f"], p["b_f"], list(range(T)))
    hb = run(p["wih_b"], p["whh_b"], p["b_b"], list(range(T - 1, -1, -1)))
    scores = jnp.concatenate(
        [jnp.concatenate([hf[t], hb[t]], axis=-1) @ p["att_w"].T + p["att_b"]
         for t in range(T)], axis=-1)               # (N, T)
    alpha = jax.nn.softmax(scores, axis=-1)
    return jnp.sum(x * alpha[:, :, None], axis=1)


# ----------------------------------- main ------------------------------------

if __name__ == "__main__":
    key = jax.random.PRNGKey(0)

    # ---------- primary, lane-aligned config ----------
    N, Fi, T = 512, 32, 4                           # nodes, feat dim, GNN layers
    keys = jax.random.split(key, T)
    feat_list = [jax.random.normal(keys[t], (N, Fi), jnp.float32) for t in range(T)]

    jk_cat = JumpingKnowledge("cat")
    out_cat = jax.block_until_ready(jk_cat(feat_list))
    assert out_cat.shape == (N, T * Fi)
    assert jnp.allclose(out_cat, jnp.concatenate(feat_list, axis=-1)), "cat mismatch"

    jk_max = JumpingKnowledge("max")
    out_max = jax.block_until_ready(jk_max(feat_list))
    assert out_max.shape == (N, Fi)
    assert jnp.allclose(out_max, jnp.max(jnp.stack(feat_list, 0), 0)), "max mismatch"

    jk_lstm = JumpingKnowledge("lstm", in_feats=Fi, num_layers=T)
    out_lstm = jax.block_until_ready(jk_lstm(feat_list))
    ref_lstm = _lstm_reference(feat_list, jk_lstm)
    assert out_lstm.shape == (N, Fi)
    assert jnp.allclose(out_lstm, ref_lstm, atol=2e-3, rtol=2e-3), "lstm mismatch"

    # ---------- ragged N / padded hidden config (robustness) ----------
    N2, Fi2, T2 = 200, 16, 5                        # H=40 -> padded to 64
    keys2 = jax.random.split(jax.random.PRNGKey(1), T2)
    feats2 = [jax.random.normal(keys2[t], (N2, Fi2), jnp.float32) for t in range(T2)]

    out2_cat = jax.block_until_ready(JumpingKnowledge("cat")(feats2))
    assert jnp.allclose(out2_cat, jnp.concatenate(feats2, axis=-1)), "cat2 mismatch"
    out2_max = jax.block_until_ready(JumpingKnowledge("max")(feats2))
    assert jnp.allclose(out2_max, jnp.max(jnp.stack(feats2, 0), 0)), "max2 mismatch"
    jk2 = JumpingKnowledge("lstm", in_feats=Fi2, num_layers=T2)
    out2 = jax.block_until_ready(jk2(feats2))
    assert jnp.allclose(out2, _lstm_reference(feats2, jk2),
                        atol=2e-3, rtol=2e-3), "lstm2 mismatch"

    print("KERNEL_OK")
</pallas_src>

<mosaic_0001>
module attributes {stable_mosaic.version = 11 : i64} {
  func.func @kernel(%arg0: i32, %arg1: memref<256x32xf32, #tpu.memory_space<vmem>>, %arg2: memref<256x32xf32, #tpu.memory_space<vmem>>, %arg3: memref<256x32xf32, #tpu.memory_space<vmem>>, %arg4: memref<256x32xf32, #tpu.memory_space<vmem>>, %arg5: memref<256x128xf32, #tpu.memory_space<vmem>>) attributes {dimension_semantics = [#tpu.dimension_semantics<parallel>], iteration_bounds = array<i64: 2>, scalar_prefetch = 0 : i64, scratch_operands = 0 : i64, tpu.core_type = #tpu.core_type<tc>, window_params = [{transform_indices = @transform_0, window_bounds = array<i64: 256, 32>}, {transform_indices = @transform_1, window_bounds = array<i64: 256, 32>}, {transform_indices = @transform_2, window_bounds = array<i64: 256, 32>}, {transform_indices = @transform_3, window_bounds = array<i64: 256, 32>}, {transform_indices = @transform_4, window_bounds = array<i64: 256, 128>}]} {
    %c0 = arith.constant 0 : index
    %c0_0 = arith.constant 0 : index
    %0 = vector.load %arg1[%c0, %c0_0] : memref<256x32xf32, #tpu.memory_space<vmem>>, vector<256x32xf32>
    %c0_1 = arith.constant 0 : index
    %c0_2 = arith.constant 0 : index
    %1 = vector.load %arg2[%c0_1, %c0_2] : memref<256x32xf32, #tpu.memory_space<vmem>>, vector<256x32xf32>
    %c0_3 = arith.constant 0 : index
    %c0_4 = arith.constant 0 : index
    %2 = vector.load %arg3[%c0_3, %c0_4] : memref<256x32xf32, #tpu.memory_space<vmem>>, vector<256x32xf32>
    %c0_5 = arith.constant 0 : index
    %c0_6 = arith.constant 0 : index
    %3 = vector.load %arg4[%c0_5, %c0_6] : memref<256x32xf32, #tpu.memory_space<vmem>>, vector<256x32xf32>
    %4 = tpu.concatenate %0, %1, %2, %3 in 1 : vector<256x32xf32>, vector<256x32xf32>, vector<256x32xf32>, vector<256x32xf32> -> vector<256x128xf32>
    %c0_7 = arith.constant 0 : index
    %c0_8 = arith.constant 0 : index
    %5 = vector.load %arg5[%c0_7, %c0_8] : memref<256x128xf32, #tpu.memory_space<vmem>>, vector<256x128xf32>
    tpu.vector_store %arg5[%c0_7, %c0_8], %4 {strides = array<i32>} : memref<256x128xf32, #tpu.memory_space<vmem>>, vector<256x128xf32>,
    return
  }
  func.func @transform_0(%arg0: i32) -> (i32, i32) {
    %c0_i32 = arith.constant 0 : i32
    %c0_i32_0 = arith.constant 0 : i32
    return %arg0, %c0_i32 : i32, i32
  }
  func.func @transform_1(%arg0: i32) -> (i32, i32) {
    %c0_i32 = arith.constant 0 : i32
    %c0_i32_0 = arith.constant 0 : i32
    return %arg0, %c0_i32 : i32, i32
  }
  func.func @transform_2(%arg0: i32) -> (i32, i32) {
    %c0_i32 = arith.constant 0 : i32
    %c0_i32_0 = arith.constant 0 : i32
    return %arg0, %c0_i32 : i32, i32
  }
  func.func @transform_3(%arg0: i32) -> (i32, i32) {
    %c0_i32 = arith.constant 0 : i32
    %c0_i32_0 = arith.constant 0 : i32
    return %arg0, %c0_i32 : i32, i32
  }
  func.func @transform_4(%arg0: i32) -> (i32, i32) {
    %c0_i32 = arith.constant 0 : i32
    %c0_i32_0 = arith.constant 0 : i32
    return %arg0, %c0_i32 : i32, i32
  }
}

</mosaic_0001>

<bundles_post_ra>
// kernel: tpu_custom_call.1
= control target key start
LH: loop header
LB: loop body
LE: loop exit
PB: predicated region body
PF: predicated region fallthrough
CT: control target
= control target key end

     0   :  { %9 = vsyncpa [#allocation3], 0  ;;  %s1821_s0 = inlined_call_operand.vmem [shape: f32[512,32], index: 0, kind: input, shape index: {}]   ;;  %s1822_s1 = inlined_call_operand.vmem [shape: f32[512,32], index: 1, kind: input, shape index: {}]   ;;  %s1823_s2 = inlined_call_operand.vmem [shape: f32[512,32], index: 2, kind: input, shape index: {}]   ;;  %s1824_s3 = inlined_call_operand.vmem [shape: f32[512,32], index: 3, kind: input, shape index: {}]   ;;  %s1825_s4 = inlined_call_operand.hbm [shape: f32[512,128], index: 4, kind: output, shape index: {}]  }
   0x1   :  { %11 = vsyncpa [#allocation3 + $0x1], 0  ;;  %s1176_s15 = smov 0   ;;  %s1178_s16 = smov 0  }
   0x2   :  { %s1180_s17 = smov 0   ;;  %s1182_s18 = smov 0  }
   0x3 LB: > { %s1197_s19 = sadd.s32 4294967295, %s1143_s18   ;;  %s1020_s20 = sadd.s32 4294967294, %s1143_s18   ;;  %s1143_s18 = sphi %s1182_s18, %s1843_s18   ;;  %s1139_s17 = sphi %s1180_s17, %s1842_s17   ;;  %s1135_s16 = sphi %s1178_s16, %s1841_s16   ;;  %s1131_s15 = sphi %s1176_s15, %s1840_s15  }
   0x4   : > { %s1201_s21 = sadd.s32 1, %s1143_s18   ;;  %s128_s22 = sadd.s32 1, %s1139_s17 }
   0x5   : > { %s125_s23 = ssub.s32 %s1143_s18, %s1201_s21  ;;  %p138_p0 = scmp.ne.s32.totalorder %s1139_s17, %s1135_s16 }
   0x6   : > { %p126_p1 = scmp.eq.s32.totalorder %s125_s23, 0  ;;  %p139_p2 = scmp.eq.s32.totalorder %s1197_s19, 1 }
   0x7   : > { %p144_p3 = scmp.ne.s32.totalorder %s1135_s16, %s1131_s15  ;;  %p145_p4 = scmp.eq.s32.totalorder %s1020_s20, 1 }
   0x8   : > { %s1212_s24 = scalar_select %p126_p1, %s1139_s17, %s128_s22  }
   0x9   : > { %p1214_p5 = por %p139_p2, %p138_p0  ;;  %p1218_p6 = por %p145_p4, %p144_p3 }
   0xa   : > { %p1023_p7 = scmp.ge.s32.totalorder %s1143_s18, 1  ;;  %p199_p8 = scmp.lt.s32.totalorder %s1143_s18, 3 }
   0xc   : > { %p200_p9 = pnand %p1023_p7, %p199_p8 }
   0xe   : > { %203 = sbr.rel (%p200_p9) target bundleno = 344 (0x158), region = 36 }
  0x13   : > { %s1025_s27 = sshll.u32 %s1197_s19, 5  ;;  %s1145_s6 = smov 32   ;;  %vm777_vm0 = vcmask 261120   ;;  %vm810_vm1 = vcmask 523264   ;;  %vm843_vm2 = vcmask 785408  }
  0x14   : > { %p241_p10 = scmp.lt.s32.totalorder %s1025_s27, 63  ;;  %s1146_s10 = smov 64  }
  0x15   : > { %s1147_s23 = smov 96   ;;  %s1038_s30 = sshll.u32 %s1197_s19, 12 }
  0x16   : > { %s1845_s27 = smov (!%p241_p10, %s1025_s27), 63  ;;  %s1765_s8 = scalar_lea.hbm %s1825_s4, %s1038_s30 }
  0x17   : > { %s1225_s28 = sshll.u32 %s1845_s27, 3  ;;  %s237_s27 = sand.u32 1, %s1135_s16  }
  0x18   : > { %s1231_s5 = scalar_lea.vmem %s1822_s1, %s1225_s28  ;;  %s1299_s9 = scalar_lea.vmem %s1823_s2, %s1225_s28 }
  0x19   : > { %v299_v0 = vld [vmem:[%s1231_s5 + $0x10] sm:$0xff]  ;;  %v297_v1 = vld [vmem:[%s1231_s5] sm:$0xff]  ;;  %v300_v2 = vld [vmem:[%s1231_s5 + $0x18] sm:$0xff]  ;;  %s1357_s13 = scalar_lea.vmem %s1821_s0, %s1225_s28  ;;  %s1393_s22 = scalar_lea.vmem %s1824_s3, %s1225_s28 }
  0x1a   : > { %429 = vrot.lane.b32.xlu1 %v299_v0, %s1145_s6  ;;  %425 = vrot.lane.b32.xlu0 %v297_v1, %s1145_s6  ;;  %v298_v3 = vld [vmem:[%s1231_s5 + $0x8] sm:$0xff]  ;;  %v301_v5 = vld [vmem:[%s1231_s5 + $0x20] sm:$0xff]  ;;  %s1024_s28 = sshll.u32 %s237_s27, 8  ;;  %s1781_s19 = scalar_lea.sflag [#allocation3], %s237_s27 }
  0x1b   : > { %v302_v4 = vld [vmem:[%s1231_s5 + $0x28] sm:$0xff]  ;;  %v304_v6 = vld [vmem:[%s1231_s5 + $0x38] sm:$0xff]  ;;  %v303_v7 = vld [vmem:[%s1231_s5 + $0x30] sm:$0xff]  ;;  %s1624_s29 = scalar_lea.vmem [#allocation2], %s1024_s28 }
  0x1c   : > { %v306_v8 = vld [vmem:[%s1231_s5 + $0x48] sm:$0xff]  ;;  %v305_v9 = vld [vmem:[%s1231_s5 + $0x40] sm:$0xff]  ;;  %v308_v10 = vld [vmem:[%s1231_s5 + $0x58] sm:$0xff] }
  0x1d   : > { %v307_v11 = vld [vmem:[%s1231_s5 + $0x50] sm:$0xff]  ;;  %v310_v12 = vld [vmem:[%s1231_s5 + $0x68] sm:$0xff]  ;;  %v309_v13 = vld [vmem:[%s1231_s5 + $0x60] sm:$0xff] }
  0x1e   : > { %431 = vrot.lane.b32.xlu1 %v300_v2, %s1145_s6  ;;  %427 = vrot.lane.b32.xlu0 %v298_v3, %s1145_s6  ;;  %v312_v14 = vld [vmem:[%s1231_s5 + $0x78] sm:$0xff]  ;;  %v311_v15 = vld [vmem:[%s1231_s5 + $0x70] sm:$0xff] }
  0x1f   : > { %v314_v16 = vld [vmem:[%s1231_s5 + $0x88] sm:$0xff]  ;;  %v313_v17 = vld [vmem:[%s1231_s5 + $0x80] sm:$0xff]  ;;  %v316_v18 = vld [vmem:[%s1231_s5 + $0x98] sm:$0xff] }
  0x20   : > { %v315_v19 = vld [vmem:[%s1231_s5 + $0x90] sm:$0xff]  ;;  %v318_v20 = vld [vmem:[%s1231_s5 + $0xa8] sm:$0xff]  ;;  %v317_v21 = vld [vmem:[%s1231_s5 + $0xa0] sm:$0xff] }
  0x21   : > { %v320_v22 = vld [vmem:[%s1231_s5 + $0xb8] sm:$0xff]  ;;  %v319_v23 = vld [vmem:[%s1231_s5 + $0xb0] sm:$0xff]  ;;  %v322_v24 = vld [vmem:[%s1231_s5 + $0xc8] sm:$0xff] }
  0x22   : > { %435 = vrot.lane.b32.xlu1 %v302_v4, %s1145_s6  ;;  %433 = vrot.lane.b32.xlu0 %v301_v5, %s1145_s6  ;;  %v321_v25 = vld [vmem:[%s1231_s5 + $0xc0] sm:$0xff]  ;;  %v324_v26 = vld [vmem:[%s1231_s5 + $0xd8] sm:$0xff] }
  0x23   : > { %v323_v27 = vld [vmem:[%s1231_s5 + $0xd0] sm:$0xff]  ;;  %v326_v28 = vld [vmem:[%s1231_s5 + $0xe8] sm:$0xff]  ;;  %v325_v29 = vld [vmem:[%s1231_s5 + $0xe0] sm:$0xff] }
  0x24   : > { %v328_v30 = vld [vmem:[%s1231_s5 + $0xf8] sm:$0xff]  ;;  %v327_v31 = vld [vmem:[%s1231_s5 + $0xf0] sm:$0xff]  ;;  %v330_v32 = vld [vmem:[%s1299_s9 + $0x8] sm:$0xff]  ;;  %s922_s5 = sshll.u32 %s1624_s29, 4  ;;  %s1767_s5 = int_to_ptr.vmem [resolvable:$true] %s922_s5 }
  0x25   : > { %v329_v33 = vld [vmem:[%s1299_s9] sm:$0xff]  ;;  %v332_v34 = vld [vmem:[%s1299_s9 + $0x18] sm:$0xff]  ;;  %v331_v35 = vld [vmem:[%s1299_s9 + $0x10] sm:$0xff] }
  0x26   : > { %439 = vrot.lane.b32.xlu1 %v304_v6, %s1145_s6  ;;  %437 = vrot.lane.b32.xlu0 %v303_v7, %s1145_s6  ;;  %v334_v36 = vld [vmem:[%s1299_s9 + $0x28] sm:$0xff]  ;;  %v333_v37 = vld [vmem:[%s1299_s9 + $0x20] sm:$0xff] }
  0x27   : > { %v336_v38 = vld [vmem:[%s1299_s9 + $0x38] sm:$0xff]  ;;  %v335_v39 = vld [vmem:[%s1299_s9 + $0x30] sm:$0xff]  ;;  %v338_v40 = vld [vmem:[%s1299_s9 + $0x48] sm:$0xff] }
  0x28   : > { %v337_v41 = vld [vmem:[%s1299_s9 + $0x40] sm:$0xff]  ;;  %v340_v42 = vld [vmem:[%s1299_s9 + $0x58] sm:$0xff]  ;;  %v339_v43 = vld [vmem:[%s1299_s9 + $0x50] sm:$0xff] }
  0x29   : > { %v342_v44 = vld [vmem:[%s1299_s9 + $0x68] sm:$0xff]  ;;  %v341_v45 = vld [vmem:[%s1299_s9 + $0x60] sm:$0xff]  ;;  %v344_v46 = vld [vmem:[%s1299_s9 + $0x78] sm:$0xff] }
  0x2a   : > { %443 = vrot.lane.b32.xlu1 %v306_v8, %s1145_s6  ;;  %441 = vrot.lane.b32.xlu0 %v305_v9, %s1145_s6  ;;  %v343_v47 = vld [vmem:[%s1299_s9 + $0x70] sm:$0xff]  ;;  %v346_v48 = vld [vmem:[%s1299_s9 + $0x88] sm:$0xff] }
  0x2b   : > { %v345_v49 = vld [vmem:[%s1299_s9 + $0x80] sm:$0xff]  ;;  %v348_v50 = vld [vmem:[%s1299_s9 + $0x98] sm:$0xff]  ;;  %v347_v51 = vld [vmem:[%s1299_s9 + $0x90] sm:$0xff] }
  0x2c   : > { %v350_v52 = vld [vmem:[%s1299_s9 + $0xa8] sm:$0xff]  ;;  %v349_v53 = vld [vmem:[%s1299_s9 + $0xa0] sm:$0xff]  ;;  %v352_v54 = vld [vmem:[%s1299_s9 + $0xb8] sm:$0xff] }
  0x2d   : > { %v351_v55 = vld [vmem:[%s1299_s9 + $0xb0] sm:$0xff]  ;;  %v354_v56 = vld [vmem:[%s1299_s9 + $0xc8] sm:$0xff]  ;;  %v353_v57 = vld [vmem:[%s1299_s9 + $0xc0] sm:$0xff] }
  0x2e   : > { %447 = vrot.lane.b32.xlu1 %v308_v10, %s1145_s6  ;;  %445 = vrot.lane.b32.xlu0 %v307_v11, %s1145_s6  ;;  %v267_v58 = vld [vmem:[%s1357_s13 + $0x10] sm:$0xff]  ;;  %v265_v59 = vld [vmem:[%s1357_s13] sm:$0xff] }
  0x2f   : > { %v356_v60 = vld [vmem:[%s1299_s9 + $0xd8] sm:$0xff]  ;;  %v355_v61 = vld [vmem:[%s1299_s9 + $0xd0] sm:$0xff]  ;;  %v266_v3 = vld [vmem:[%s1357_s13 + $0x8] sm:$0xff] }
  0x30   : > { %v268_v2 = vld [vmem:[%s1357_s13 + $0x18] sm:$0xff]  ;;  %v358_v4 = vld [vmem:[%s1299_s9 + $0xe8] sm:$0xff]  ;;  %v357_v5 = vld [vmem:[%s1299_s9 + $0xe0] sm:$0xff] }
  0x31   : > { %v270_v10 = vld [vmem:[%s1357_s13 + $0x28] sm:$0xff]  ;;  %v269_v11 = vld [vmem:[%s1357_s13 + $0x20] sm:$0xff] }
  0x32   : > { %451 = vrot.lane.b32.xlu1 %v310_v12, %s1145_s6  ;;  %449 = vrot.lane.b32.xlu0 %v309_v13, %s1145_s6  ;;  %v360_v12 = vld [vmem:[%s1299_s9 + $0xf8] sm:$0xff]  ;;  %v359_v13 = vld [vmem:[%s1299_s9 + $0xf0] sm:$0xff]  ;;  %s1083_s9 = scalar_lea.vmem %s1767_s5, 4096 }
  0x33   : > { %p1084_p11 = scmp.ne.s32.totalorder %s1767_s5, %s1083_s9 }
  0x35   : > { %p1085_p12 = pnand %p1084_p11, %p1214_p5 }
  0x36   : > { %455 = vrot.lane.b32.xlu1 %v312_v14, %s1145_s6  ;;  %453 = vrot.lane.b32.xlu0 %v311_v15, %s1145_s6 }
  0x37   : > { %p1086_p13 = pneg %p1085_p12 }
  0x3a   : > { %459 = vrot.lane.b32.xlu1 %v314_v16, %s1145_s6  ;;  %457 = vrot.lane.b32.xlu0 %v313_v17, %s1145_s6 }
  0x3e   : > { %463 = vrot.lane.b32.xlu1 %v316_v18, %s1145_s6  ;;  %461 = vrot.lane.b32.xlu0 %v315_v19, %s1145_s6  ;;  %v272_v18 = vld [vmem:[%s1357_s13 + $0x38] sm:$0xff]  ;;  %v271_v19 = vld [vmem:[%s1357_s13 + $0x30] sm:$0xff] }
  0x42   : > { %467 = vrot.lane.b32.xlu1 %v318_v20, %s1145_s6  ;;  %465 = vrot.lane.b32.xlu0 %v317_v21, %s1145_s6  ;;  %v362_v20 = vld [vmem:[%s1393_s22 + $0x8] sm:$0xff]  ;;  %v361_v21 = vld [vmem:[%s1393_s22] sm:$0xff] }
  0x46   : > { %471 = vrot.lane.b32.xlu1 %v320_v22, %s1145_s6  ;;  %469 = vrot.lane.b32.xlu0 %v319_v23, %s1145_s6 }
  0x4a   : > { %475 = vrot.lane.b32.xlu1 %v322_v24, %s1145_s6  ;;  %473 = vrot.lane.b32.xlu0 %v321_v25, %s1145_s6 }
  0x4e   : > { %479 = vrot.lane.b32.xlu1 %v324_v26, %s1145_s6  ;;  %477 = vrot.lane.b32.xlu0 %v323_v27, %s1145_s6  ;;  %v274_v26 = vld [vmem:[%s1357_s13 + $0x48] sm:$0xff]  ;;  %v273_v27 = vld [vmem:[%s1357_s13 + $0x40] sm:$0xff] }
  0x52   : > { %483 = vrot.lane.b32.xlu1 %v326_v28, %s1145_s6  ;;  %481 = vrot.lane.b32.xlu0 %v325_v29, %s1145_s6  ;;  %v364_v28 = vld [vmem:[%s1393_s22 + $0x18] sm:$0xff]  ;;  %v363_v29 = vld [vmem:[%s1393_s22 + $0x10] sm:$0xff] }
  0x56   : > { %487 = vrot.lane.b32.xlu1 %v328_v30, %s1145_s6  ;;  %485 = vrot.lane.b32.xlu0 %v327_v31, %s1145_s6 }
  0x5a   : > { %555 = vrot.lane.b32.xlu1 %v330_v32, %s1146_s10  ;;  %553 = vrot.lane.b32.xlu0 %v329_v33, %s1146_s10 }
  0x5e   : > { %559 = vrot.lane.b32.xlu1 %v332_v34, %s1146_s10  ;;  %557 = vrot.lane.b32.xlu0 %v331_v35, %s1146_s10  ;;  %v276_v34 = vld [vmem:[%s1357_s13 + $0x58] sm:$0xff]  ;;  %v275_v35 = vld [vmem:[%s1357_s13 + $0x50] sm:$0xff] }
  0x62   : > { %563 = vrot.lane.b32.xlu1 %v334_v36, %s1146_s10  ;;  %561 = vrot.lane.b32.xlu0 %v333_v37, %s1146_s10  ;;  %v366_v36 = vld [vmem:[%s1393_s22 + $0x28] sm:$0xff]  ;;  %v365_v37 = vld [vmem:[%s1393_s22 + $0x20] sm:$0xff] }
  0x66   : > { %567 = vrot.lane.b32.xlu1 %v336_v38, %s1146_s10  ;;  %565 = vrot.lane.b32.xlu0 %v335_v39, %s1146_s10 }
  0x6a   : > { %571 = vrot.lane.b32.xlu1 %v338_v40, %s1146_s10  ;;  %569 = vrot.lane.b32.xlu0 %v337_v41, %s1146_s10 }
  0x6e   : > { %575 = vrot.lane.b32.xlu1 %v340_v42, %s1146_s10  ;;  %573 = vrot.lane.b32.xlu0 %v339_v43, %s1146_s10  ;;  %v278_v42 = vld [vmem:[%s1357_s13 + $0x68] sm:$0xff]  ;;  %v277_v43 = vld [vmem:[%s1357_s13 + $0x60] sm:$0xff] }
  0x72   : > { %579 = vrot.lane.b32.xlu1 %v342_v44, %s1146_s10  ;;  %577 = vrot.lane.b32.xlu0 %v341_v45, %s1146_s10  ;;  %v368_v44 = vld [vmem:[%s1393_s22 + $0x38] sm:$0xff]  ;;  %v367_v45 = vld [vmem:[%s1393_s22 + $0x30] sm:$0xff] }
  0x76   : > { %583 = vrot.lane.b32.xlu1 %v344_v46, %s1146_s10  ;;  %581 = vrot.lane.b32.xlu0 %v343_v47, %s1146_s10 }
  0x7a   : > { %587 = vrot.lane.b32.xlu1 %v346_v48, %s1146_s10  ;;  %585 = vrot.lane.b32.xlu0 %v345_v49, %s1146_s10 }
  0x7e   : > { %591 = vrot.lane.b32.xlu1 %v348_v50, %s1146_s10  ;;  %589 = vrot.lane.b32.xlu0 %v347_v51, %s1146_s10  ;;  %v280_v50 = vld [vmem:[%s1357_s13 + $0x78] sm:$0xff]  ;;  %v279_v51 = vld [vmem:[%s1357_s13 + $0x70] sm:$0xff] }
  0x82   : > { %595 = vrot.lane.b32.xlu1 %v350_v52, %s1146_s10  ;;  %593 = vrot.lane.b32.xlu0 %v349_v53, %s1146_s10  ;;  %v370_v52 = vld [vmem:[%s1393_s22 + $0x48] sm:$0xff]  ;;  %v369_v53 = vld [vmem:[%s1393_s22 + $0x40] sm:$0xff] }
  0x86   : > { %599 = vrot.lane.b32.xlu1 %v352_v54, %s1146_s10  ;;  %597 = vrot.lane.b32.xlu0 %v351_v55, %s1146_s10 }
  0x8a   : > { %603 = vrot.lane.b32.xlu1 %v354_v56, %s1146_s10  ;;  %601 = vrot.lane.b32.xlu0 %v353_v57, %s1146_s10 }
  0x8c   : > { %v430_v62 = vpop.permute.xlu1 %429  ;;  %v426_v63 = vpop.permute.xlu0 %425 }
  0x8d   : > { %v1366_v0 = vsel %vm777_vm0, %v267_v58, %v430_v62  ;;  %v1369_v1 = vsel %vm777_vm0, %v265_v59, %v426_v63  ;;  %v282_v58 = vld [vmem:[%s1357_s13 + $0x88] sm:$0xff]  ;;  %v281_v59 = vld [vmem:[%s1357_s13 + $0x80] sm:$0xff] }
  0x8e   : > { %607 = vrot.lane.b32.xlu1 %v356_v60, %s1146_s10  ;;  %605 = vrot.lane.b32.xlu0 %v355_v61, %s1146_s10  ;;  %v372_v60 = vld [vmem:[%s1393_s22 + $0x58] sm:$0xff]  ;;  %v371_v61 = vld [vmem:[%s1393_s22 + $0x50] sm:$0xff] }
  0x90   : > { %v432_v6 = vpop.permute.xlu1 %431  ;;  %v428_v7 = vpop.permute.xlu0 %427 }
  0x91   : > { %v1378_v8 = vsel %vm777_vm0, %v268_v2, %v432_v6  ;;  %v1381_v9 = vsel %vm777_vm0, %v266_v3, %v428_v7  ;;  %v374_v6 = vld [vmem:[%s1393_s22 + $0x68] sm:$0xff]  ;;  %v373_v7 = vld [vmem:[%s1393_s22 + $0x60] sm:$0xff] }
  0x92   : > { %611 = vrot.lane.b32.xlu1 %v358_v4, %s1146_s10  ;;  %609 = vrot.lane.b32.xlu0 %v357_v5, %s1146_s10  ;;  %v284_v4 = vld [vmem:[%s1357_s13 + $0x98] sm:$0xff]  ;;  %v283_v5 = vld [vmem:[%s1357_s13 + $0x90] sm:$0xff] }
  0x94   : > { %v436_v14 = vpop.permute.xlu1 %435  ;;  %v434_v15 = vpop.permute.xlu0 %433 }
  0x95   : > { %v1396_v16 = vsel %vm777_vm0, %v270_v10, %v436_v14  ;;  %v1399_v17 = vsel %vm777_vm0, %v269_v11, %v434_v15  ;;  %v286_v14 = vld [vmem:[%s1357_s13 + $0xa8] sm:$0xff]  ;;  %v285_v15 = vld [vmem:[%s1357_s13 + $0xa0] sm:$0xff] }
  0x96   : > { %615 = vrot.lane.b32.xlu1 %v360_v12, %s1146_s10  ;;  %613 = vrot.lane.b32.xlu0 %v359_v13, %s1146_s10  ;;  %s1148_s10 = smov [#allocation2]  }
  0x97   : > { %s1087_s11 = sshll.u32 %s1148_s10, 4  ;;  %s1088_s11 = int_to_ptr.vmem [resolvable:$false] %s1087_s11 }
  0x98   : > { %v440_v22 = vpop.permute.xlu1 %439  ;;  %v438_v23 = vpop.permute.xlu0 %437  ;;  %s1089_s12 = scalar_lea.vmem %s1088_s11, 8192  ;;  %p1090_p0 = scmp.lt.s32.totalorder %s1767_s5, %s1088_s11 }
  0x99   : > { %v1408_v24 = vsel %vm777_vm0, %v272_v18, %v440_v22  ;;  %v1411_v25 = vsel %vm777_vm0, %v271_v19, %v438_v23  ;;  %v376_v18 = vld [vmem:[%s1393_s22 + $0x78] sm:$0xff]  ;;  %v375_v19 = vld [vmem:[%s1393_s22 + $0x70] sm:$0xff]  ;;  %p1091_p1 = scmp.lt.s32.totalorder %s1089_s12, %s1083_s9 }
  0x9a   : > { %683 = vrot.lane.b32.xlu1 %v362_v20, %s1147_s23  ;;  %681 = vrot.lane.b32.xlu0 %v361_v21, %s1147_s23 }
  0x9b   : > { %p1092_p2 = por %p1091_p1, %p1090_p0 }
  0x9c   : > { %v444_v30 = vpop.permute.xlu1 %443  ;;  %v442_v31 = vpop.permute.xlu0 %441 }
  0x9d   : > { %v1420_v32 = vsel %vm777_vm0, %v274_v26, %v444_v30  ;;  %v1423_v33 = vsel %vm777_vm0, %v273_v27, %v442_v31  ;;  %v288_v26 = vld [vmem:[%s1357_s13 + $0xb8] sm:$0xff]  ;;  %v287_v27 = vld [vmem:[%s1357_s13 + $0xb0] sm:$0xff]  ;;  %p1093_p3 = pnand %p1092_p2, %p1086_p13 }
  0x9e   : > { %687 = vrot.lane.b32.xlu1 %v364_v28, %s1147_s23  ;;  %685 = vrot.lane.b32.xlu0 %v363_v29, %s1147_s23  ;;  %v378_v28 = vld [vmem:[%s1393_s22 + $0x88] sm:$0xff]  ;;  %v377_v29 = vld [vmem:[%s1393_s22 + $0x80] sm:$0xff] }
  0xa0   : > { %v448_v38 = vpop.permute.xlu1 %447  ;;  %v446_v39 = vpop.permute.xlu0 %445 }
  0xa1   : > { %v1432_v40 = vsel %vm777_vm0, %v276_v34, %v448_v38  ;;  %v1435_v41 = vsel %vm777_vm0, %v275_v35, %v446_v39  ;;  %v380_v38 = vld [vmem:[%s1393_s22 + $0x98] sm:$0xff]  ;;  %v379_v39 = vld [vmem:[%s1393_s22 + $0x90] sm:$0xff] }
  0xa2   : > { %691 = vrot.lane.b32.xlu1 %v366_v36, %s1147_s23  ;;  %689 = vrot.lane.b32.xlu0 %v365_v37, %s1147_s23  ;;  %v290_v36 = vld [vmem:[%s1357_s13 + $0xc8] sm:$0xff]  ;;  %v289_v37 = vld [vmem:[%s1357_s13 + $0xc0] sm:$0xff] }
  0xa4   : > { %v452_v46 = vpop.permute.xlu1 %451  ;;  %v450_v47 = vpop.permute.xlu0 %449 }
  0xa5   : > { %v1444_v48 = vsel %vm777_vm0, %v278_v42, %v452_v46  ;;  %v1447_v49 = vsel %vm777_vm0, %v277_v43, %v450_v47  ;;  %v292_v46 = vld [vmem:[%s1357_s13 + $0xd8] sm:$0xff]  ;;  %v291_v47 = vld [vmem:[%s1357_s13 + $0xd0] sm:$0xff] }
  0xa6   : > { %695 = vrot.lane.b32.xlu1 %v368_v44, %s1147_s23  ;;  %693 = vrot.lane.b32.xlu0 %v367_v45, %s1147_s23 }
  0xa8   : > { %v456_v54 = vpop.permute.xlu1 %455  ;;  %v454_v55 = vpop.permute.xlu0 %453 }
  0xa9   : > { %v1456_v56 = vsel %vm777_vm0, %v280_v50, %v456_v54  ;;  %v1459_v57 = vsel %vm777_vm0, %v279_v51, %v454_v55  ;;  %v382_v50 = vld [vmem:[%s1393_s22 + $0xa8] sm:$0xff]  ;;  %v381_v51 = vld [vmem:[%s1393_s22 + $0xa0] sm:$0xff] }
  0xaa   : > { %699 = vrot.lane.b32.xlu1 %v370_v52, %s1147_s23  ;;  %697 = vrot.lane.b32.xlu0 %v369_v53, %s1147_s23 }
  0xac   : > { %v460_v62 = vpop.permute.xlu1 %459  ;;  %v458_v63 = vpop.permute.xlu0 %457 }
  0xad   : > { %v1468_v2 = vsel %vm777_vm0, %v282_v58, %v460_v62  ;;  %v1471_v3 = vsel %vm777_vm0, %v281_v59, %v458_v63  ;;  %v294_v58 = vld [vmem:[%s1357_s13 + $0xe8] sm:$0xff]  ;;  %v293_v59 = vld [vmem:[%s1357_s13 + $0xe0] sm:$0xff] }
  0xae   : > { %703 = vrot.lane.b32.xlu1 %v372_v60, %s1147_s23  ;;  %701 = vrot.lane.b32.xlu0 %v371_v61, %s1147_s23  ;;  %v384_v60 = vld [vmem:[%s1393_s22 + $0xb8] sm:$0xff]  ;;  %v383_v61 = vld [vmem:[%s1393_s22 + $0xb0] sm:$0xff] }
  0xb0   : > { %v464_v10 = vpop.permute.xlu1 %463  ;;  %v462_v11 = vpop.permute.xlu0 %461 }
  0xb1   : > { %v1480_v12 = vsel %vm777_vm0, %v284_v4, %v464_v10  ;;  %v1483_v13 = vsel %vm777_vm0, %v283_v5, %v462_v11  ;;  %v386_v10 = vld [vmem:[%s1393_s22 + $0xc8] sm:$0xff]  ;;  %v385_v11 = vld [vmem:[%s1393_s22 + $0xc0] sm:$0xff] }
  0xb2   : > { %707 = vrot.lane.b32.xlu1 %v374_v6, %s1147_s23  ;;  %705 = vrot.lane.b32.xlu0 %v373_v7, %s1147_s23  ;;  %v296_v6 = vld [vmem:[%s1357_s13 + $0xf8] sm:$0xff]  ;;  %v295_v7 = vld [vmem:[%s1357_s13 + $0xf0] sm:$0xff] }
  0xb4   : > { %v468_v20 = vpop.permute.xlu1 %467  ;;  %v466_v21 = vpop.permute.xlu0 %465 }
  0xb5   : > { %v1492_v22 = vsel %vm777_vm0, %v286_v14, %v468_v20  ;;  %v1495_v23 = vsel %vm777_vm0, %v285_v15, %v466_v21  ;;  %v388_v20 = vld [vmem:[%s1393_s22 + $0xd8] sm:$0xff]  ;;  %v387_v21 = vld [vmem:[%s1393_s22 + $0xd0] sm:$0xff] }
  0xb6   : > { %711 = vrot.lane.b32.xlu1 %v376_v18, %s1147_s23  ;;  %709 = vrot.lane.b32.xlu0 %v375_v19, %s1147_s23 }
  0xb8   : > { %v472_v30 = vpop.permute.xlu1 %471  ;;  %v470_v31 = vpop.permute.xlu0 %469 }
  0xb9   : > { %v1504_v34 = vsel %vm777_vm0, %v288_v26, %v472_v30  ;;  %v1507_v35 = vsel %vm777_vm0, %v287_v27, %v470_v31 }
  0xba   : > { %715 = vrot.lane.b32.xlu1 %v378_v28, %s1147_s23  ;;  %713 = vrot.lane.b32.xlu0 %v377_v29, %s1147_s23  ;;  %v390_v28 = vld [vmem:[%s1393_s22 + $0xe8] sm:$0xff]  ;;  %v389_v29 = vld [vmem:[%s1393_s22 + $0xe0] sm:$0xff] }
  0xbc   : > { %v476_v42 = vpop.permute.xlu1 %475  ;;  %v474_v43 = vpop.permute.xlu0 %473 }
  0xbd   : > { %v1516_v44 = vsel %vm777_vm0, %v290_v36, %v476_v42  ;;  %v1519_v45 = vsel %vm777_vm0, %v289_v37, %v474_v43  ;;  %v392_v36 = vld [vmem:[%s1393_s22 + $0xf8] sm:$0xff]  ;;  %v391_v37 = vld [vmem:[%s1393_s22 + $0xf0] sm:$0xff] }
  0xbe   : > { %719 = vrot.lane.b32.xlu1 %v380_v38, %s1147_s23  ;;  %717 = vrot.lane.b32.xlu0 %v379_v39, %s1147_s23 }
  0xc0   : > { %v480_v52 = vpop.permute.xlu1 %479  ;;  %v478_v53 = vpop.permute.xlu0 %477 }
  0xc1   : > { %v1528_v54 = vsel %vm777_vm0, %v292_v46, %v480_v52  ;;  %v1531_v55 = vsel %vm777_vm0, %v291_v47, %v478_v53 }
  0xc2   : > { %723 = vrot.lane.b32.xlu1 %v382_v50, %s1147_s23  ;;  %721 = vrot.lane.b32.xlu0 %v381_v51, %s1147_s23 }
  0xc4   : > { %v484_v62 = vpop.permute.xlu1 %483  ;;  %v482_v63 = vpop.permute.xlu0 %481 }
  0xc5   : > { %v1540_v4 = vsel %vm777_vm0, %v294_v58, %v484_v62  ;;  %v1543_v5 = vsel %vm777_vm0, %v293_v59, %v482_v63 }
  0xc6   : > { %1828 = vst [vmem:[#allocation5_spill] sm:$0xff] %v1540_v4  ;;  %1829 = vst [vmem:[#allocation6_spill] sm:$0xff] %v1543_v5  ;;  %727 = vrot.lane.b32.xlu1 %v384_v60, %s1147_s23  ;;  %725 = vrot.lane.b32.xlu0 %v383_v61, %s1147_s23 }
  0xc8   : > { %v488_v14 = vpop.permute.xlu1 %487  ;;  %v486_v15 = vpop.permute.xlu0 %485 }
  0xc9   : > { %v1552_v18 = vsel %vm777_vm0, %v296_v6, %v488_v14  ;;  %v1555_v19 = vsel %vm777_vm0, %v295_v7, %v486_v15 }
  0xca   : > { %1830 = vst [vmem:[#allocation7_spill] sm:$0xff] %v1552_v18  ;;  %1831 = vst [vmem:[#allocation8_spill] sm:$0xff] %v1555_v19  ;;  %731 = vrot.lane.b32.xlu1 %v386_v10, %s1147_s23  ;;  %729 = vrot.lane.b32.xlu0 %v385_v11, %s1147_s23 }
  0xcc   : > { %v556_v26 = vpop.permute.xlu1 %555  ;;  %v554_v27 = vpop.permute.xlu0 %553 }
  0xcd   : > { %v812_v19 = vsel %vm810_vm1, %v1381_v9, %v556_v26  ;;  %v811_v18 = vsel %vm810_vm1, %v1369_v1, %v554_v27 }
  0xce   : > { %735 = vrot.lane.b32.xlu1 %v388_v20, %s1147_s23  ;;  %733 = vrot.lane.b32.xlu0 %v387_v21, %s1147_s23 }
  0xd0   : > { %v560_v30 = vpop.permute.xlu1 %559  ;;  %v558_v31 = vpop.permute.xlu0 %557 }
  0xd1   : > { %v814_v9 = vsel %vm810_vm1, %v1378_v8, %v560_v30  ;;  %v813_v1 = vsel %vm810_vm1, %v1366_v0, %v558_v31 }
  0xd2   : > { %739 = vrot.lane.b32.xlu1 %v390_v28, %s1147_s23  ;;  %737 = vrot.lane.b32.xlu0 %v389_v29, %s1147_s23 }
  0xd4   : > { %v564_v38 = vpop.permute.xlu1 %563  ;;  %v562_v39 = vpop.permute.xlu0 %561 }
  0xd5   : > { %v815_v27 = vsel %vm810_vm1, %v1399_v17, %v562_v39 }
  0xd6   : > { %743 = vrot.lane.b32.xlu1 %v392_v36, %s1147_s23  ;;  %741 = vrot.lane.b32.xlu0 %v391_v37, %s1147_s23 }
  0xd8   : > { %v568_v42 = vpop.permute.xlu1 %567  ;;  %v566_v43 = vpop.permute.xlu0 %565 }
  0xdc   : > { %v572_v46 = vpop.permute.xlu1 %571  ;;  %v570_v47 = vpop.permute.xlu0 %569 }
  0xe0   : > { %v1571_v50 = vpop.permute.xlu1 %575  ;;  %v1573_v51 = vpop.permute.xlu0 %573 }
  0xe4   : > { %v1575_v52 = vpop.permute.xlu1 %579  ;;  %v1577_v53 = vpop.permute.xlu0 %577 }
  0xe8   : > { %v1579_v58 = vpop.permute.xlu1 %583  ;;  %v1581_v59 = vpop.permute.xlu0 %581 }
  0xec   : > { %v1583_v60 = vpop.permute.xlu1 %587  ;;  %v1585_v61 = vpop.permute.xlu0 %585 }
  0xf0   : > { %v1587_v62 = vpop.permute.xlu1 %591  ;;  %v1589_v63 = vpop.permute.xlu0 %589 }
  0xf4   : > { %v1591_v6 = vpop.permute.xlu1 %595  ;;  %v1593_v7 = vpop.permute.xlu0 %593 }
  0xf8   : > { %v1595_v10 = vpop.permute.xlu1 %599  ;;  %v1597_v11 = vpop.permute.xlu0 %597 }
  0xfc   : > { %v1599_v14 = vpop.permute.xlu1 %603  ;;  %v1601_v15 = vpop.permute.xlu0 %601 }
 0x100   : > { %v1603_v20 = vpop.permute.xlu1 %607  ;;  %v1605_v21 = vpop.permute.xlu0 %605 }
 0x104   : > { %v1607_v28 = vpop.permute.xlu1 %611  ;;  %v1609_v29 = vpop.permute.xlu0 %609 }
 0x105   : > { %1832 = vst [vmem:[#allocation9_spill] sm:$0xff] %v1607_v28  ;;  %1833 = vst [vmem:[#allocation10_spill] sm:$0xff] %v1609_v29 }
 0x108   : > { %v1612_v36 = vpop.permute.xlu1 %615  ;;  %v1614_v37 = vpop.permute.xlu0 %613 }
 0x10c   : > { %v684_v5 = vpop.permute.xlu1 %683  ;;  %v682_v4 = vpop.permute.xlu0 %681 }
 0x10d   : > { %v845_v28 = vsel %vm843_vm2, %v812_v19, %v684_v5  ;;  %v844_v29 = vsel %vm843_vm2, %v811_v18, %v682_v4  ;;  %v816_v19 = vsel %vm810_vm1, %v1396_v16, %v564_v38 }
 0x10e   : > { %877 = vst [vmem:[%s1624_s29 + $0x8] sm:$0xff] %v845_v28  ;;  %876 = vst [vmem:[%s1624_s29] sm:$0xff] %v844_v29  ;;  %v818_v28 = vsel %vm810_vm1, %v1408_v24, %v568_v42  ;;  %v817_v29 = vsel %vm810_vm1, %v1411_v25, %v566_v43 }
 0x110   : > { %v688_v26 = vpop.permute.xlu1 %687  ;;  %v686_v5 = vpop.permute.xlu0 %685 }
 0x111   : > { %v847_v4 = vsel %vm843_vm2, %v814_v9, %v688_v26  ;;  %v846_v18 = vsel %vm843_vm2, %v813_v1, %v686_v5  ;;  %v820_v9 = vsel %vm810_vm1, %v1420_v32, %v572_v46  ;;  %v819_v1 = vsel %vm810_vm1, %v1423_v33, %v570_v47 }
 0x112   : > { %879 = vst [vmem:[%s1624_s29 + $0x18] sm:$0xff] %v847_v4  ;;  %878 = vst [vmem:[%s1624_s29 + $0x10] sm:$0xff] %v846_v18  ;;  %v822_v26 = vsel %vm810_vm1, %v1432_v40, %v1571_v50  ;;  %v821_v32 = vsel %vm810_vm1, %v1435_v41, %v1573_v51  ;;  %v824_v4 = vsel %vm810_vm1, %v1444_v48, %v1575_v52 }
 0x113   : > { %v823_v40 = vsel %vm810_vm1, %v1447_v49, %v1577_v53  ;;  %v825_v48 = vsel %vm810_vm1, %v1459_v57, %v1581_v59 }
 0x114   : > { %v692_v8 = vpop.permute.xlu1 %691  ;;  %v690_v30 = vpop.permute.xlu0 %689 }
 0x115   : > { %v849_v0 = vsel %vm843_vm2, %v816_v19, %v692_v8  ;;  %v848_v31 = vsel %vm843_vm2, %v815_v27, %v690_v30  ;;  %v826_v19 = vsel %vm810_vm1, %v1456_v56, %v1579_v58  ;;  %v828_v8 = vsel %vm810_vm1, %v1468_v2, %v1583_v60 }
 0x116   : > { %881 = vst [vmem:[%s1624_s29 + $0x28] sm:$0xff] %v849_v0  ;;  %880 = vst [vmem:[%s1624_s29 + $0x20] sm:$0xff] %v848_v31  ;;  %v827_v56 = vsel %vm810_vm1, %v1471_v3, %v1585_v61  ;;  %v830_v0 = vsel %vm810_vm1, %v1480_v12, %v1587_v62  ;;  %v829_v2 = vsel %vm810_vm1, %v1483_v13, %v1589_v63 }
 0x117   : > { %v831_v12 = vsel %vm810_vm1, %v1495_v23, %v1593_v7 }
 0x118   : > { %v696_v16 = vpop.permute.xlu1 %695  ;;  %v694_v38 = vpop.permute.xlu0 %693 }
 0x119   : > { %v851_v17 = vsel %vm843_vm2, %v818_v28, %v696_v16  ;;  %v850_v39 = vsel %vm843_vm2, %v817_v29, %v694_v38  ;;  %v832_v28 = vsel %vm810_vm1, %v1492_v22, %v1591_v6  ;;  %v834_v16 = vsel %vm810_vm1, %v1504_v34, %v1595_v10 }
 0x11a   : > { %883 = vst [vmem:[%s1624_s29 + $0x38] sm:$0xff] %v851_v17  ;;  %882 = vst [vmem:[%s1624_s29 + $0x30] sm:$0xff] %v850_v39  ;;  %v833_v22 = vsel %vm810_vm1, %v1507_v35, %v1597_v11  ;;  %v836_v17 = vsel %vm810_vm1, %v1516_v44, %v1599_v14  ;;  %v835_v34 = vsel %vm810_vm1, %v1519_v45, %v1601_v15 }
 0x11b   : > { %v837_v44 = vsel %vm810_vm1, %v1531_v55, %v1605_v21 }
 0x11c   : > { %v700_v24 = vpop.permute.xlu1 %699  ;;  %v698_v42 = vpop.permute.xlu0 %697 }
 0x11d   : > { %v853_v25 = vsel %vm843_vm2, %v820_v9, %v700_v24  ;;  %v852_v43 = vsel %vm843_vm2, %v819_v1, %v698_v42  ;;  %v838_v9 = vsel %vm810_vm1, %v1528_v54, %v1603_v20  ;;  %v1834_v24 = vld [vmem:[#allocation9_spill] sm:$0xff]  ;;  %v1837_v54 = vld [vmem:[#allocation6_spill] sm:$0xff] }
 0x11e   : > { %885 = vst [vmem:[%s1624_s29 + $0x48] sm:$0xff] %v853_v25  ;;  %884 = vst [vmem:[%s1624_s29 + $0x40] sm:$0xff] %v852_v43  ;;  %v1835_v42 = vld [vmem:[#allocation5_spill] sm:$0xff]  ;;  %v1836_v43 = vld [vmem:[#allocation10_spill] sm:$0xff] }
 0x11f   : > { %v840_v25 = vsel %vm810_vm1, %v1835_v42, %v1834_v24  ;;  %v839_v20 = vsel %vm810_vm1, %v1837_v54, %v1836_v43 }
 0x120   : > { %v704_v46 = vpop.permute.xlu1 %703  ;;  %v702_v33 = vpop.permute.xlu0 %701 }
 0x121   : > { %v855_v47 = vsel %vm843_vm2, %v822_v26, %v704_v46  ;;  %v854_v5 = vsel %vm843_vm2, %v821_v32, %v702_v33  ;;  %v1838_v46 = vld [vmem:[#allocation7_spill] sm:$0xff] }
 0x122   : > { %887 = vst [vmem:[%s1624_s29 + $0x58] sm:$0xff] %v855_v47  ;;  %886 = vst [vmem:[%s1624_s29 + $0x50] sm:$0xff] %v854_v5  ;;  %v842_v33 = vsel %vm810_vm1, %v1838_v46, %v1612_v36  ;;  %v1839_v47 = vld [vmem:[#allocation8_spill] sm:$0xff] }
 0x123   : > { %v841_v5 = vsel %vm810_vm1, %v1839_v47, %v1614_v37 }
 0x124   : > { %v708_v50 = vpop.permute.xlu1 %707  ;;  %v706_v41 = vpop.permute.xlu0 %705 }
 0x125   : > { %v857_v51 = vsel %vm843_vm2, %v824_v4, %v708_v50  ;;  %v856_v18 = vsel %vm843_vm2, %v823_v40, %v706_v41 }
 0x126   : > { %889 = vst [vmem:[%s1624_s29 + $0x68] sm:$0xff] %v857_v51  ;;  %888 = vst [vmem:[%s1624_s29 + $0x60] sm:$0xff] %v856_v18 }
 0x128   : > { %v712_v52 = vpop.permute.xlu1 %711  ;;  %v710_v49 = vpop.permute.xlu0 %709 }
 0x129   : > { %v859_v53 = vsel %vm843_vm2, %v826_v19, %v712_v52  ;;  %v858_v27 = vsel %vm843_vm2, %v825_v48, %v710_v49 }
 0x12a   : > { %891 = vst [vmem:[%s1624_s29 + $0x78] sm:$0xff] %v859_v53  ;;  %890 = vst [vmem:[%s1624_s29 + $0x70] sm:$0xff] %v858_v27 }
 0x12c   : > { %v716_v58 = vpop.permute.xlu1 %715  ;;  %v714_v57 = vpop.permute.xlu0 %713 }
 0x12d   : > { %v861_v59 = vsel %vm843_vm2, %v828_v8, %v716_v58  ;;  %v860_v30 = vsel %vm843_vm2, %v827_v56, %v714_v57 }
 0x12e   : > { %893 = vst [vmem:[%s1624_s29 + $0x88] sm:$0xff] %v861_v59  ;;  %892 = vst [vmem:[%s1624_s29 + $0x80] sm:$0xff] %v860_v30 }
 0x130   : > { %v720_v60 = vpop.permute.xlu1 %719  ;;  %v718_v3 = vpop.permute.xlu0 %717 }
 0x131   : > { %v863_v61 = vsel %vm843_vm2, %v830_v0, %v720_v60  ;;  %v862_v31 = vsel %vm843_vm2, %v829_v2, %v718_v3 }
 0x132   : > { %895 = vst [vmem:[%s1624_s29 + $0x98] sm:$0xff] %v863_v61  ;;  %894 = vst [vmem:[%s1624_s29 + $0x90] sm:$0xff] %v862_v31 }
 0x134   : > { %v724_v62 = vpop.permute.xlu1 %723  ;;  %v722_v13 = vpop.permute.xlu0 %721 }
 0x135   : > { %v865_v63 = vsel %vm843_vm2, %v832_v28, %v724_v62  ;;  %v864_v29 = vsel %vm843_vm2, %v831_v12, %v722_v13 }
 0x136   : > { %897 = vst [vmem:[%s1624_s29 + $0xa8] sm:$0xff] %v865_v63  ;;  %896 = vst [vmem:[%s1624_s29 + $0xa0] sm:$0xff] %v864_v29 }
 0x138   : > { %v728_v6 = vpop.permute.xlu1 %727  ;;  %v726_v23 = vpop.permute.xlu0 %725 }
 0x139   : > { %v867_v7 = vsel %vm843_vm2, %v834_v16, %v728_v6  ;;  %v866_v38 = vsel %vm843_vm2, %v833_v22, %v726_v23 }
 0x13a   : > { %899 = vst [vmem:[%s1624_s29 + $0xb8] sm:$0xff] %v867_v7  ;;  %898 = vst [vmem:[%s1624_s29 + $0xb0] sm:$0xff] %v866_v38 }
 0x13c   : > { %v732_v10 = vpop.permute.xlu1 %731  ;;  %v730_v35 = vpop.permute.xlu0 %729 }
 0x13d   : > { %v869_v11 = vsel %vm843_vm2, %v836_v17, %v732_v10  ;;  %v868_v39 = vsel %vm843_vm2, %v835_v34, %v730_v35 }
 0x13e   : > { %901 = vst [vmem:[%s1624_s29 + $0xc8] sm:$0xff] %v869_v11  ;;  %900 = vst [vmem:[%s1624_s29 + $0xc0] sm:$0xff] %v868_v39 }
 0x140   : > { %v736_v45 = vpop.permute.xlu1 %735  ;;  %v734_v14 = vpop.permute.xlu0 %733 }
 0x141   : > { %v871_v15 = vsel %vm843_vm2, %v838_v9, %v736_v45  ;;  %v870_v1 = vsel %vm843_vm2, %v837_v44, %v734_v14 }
 0x142   : > { %903 = vst [vmem:[%s1624_s29 + $0xd8] sm:$0xff] %v871_v15  ;;  %902 = vst [vmem:[%s1624_s29 + $0xd0] sm:$0xff] %v870_v1 }
 0x144   : > { %v740_v26 = vpop.permute.xlu1 %739  ;;  %v738_v55 = vpop.permute.xlu0 %737 }
 0x145   : > { %v873_v21 = vsel %vm843_vm2, %v840_v25, %v740_v26  ;;  %v872_v32 = vsel %vm843_vm2, %v839_v20, %v738_v55 }
 0x146   : > { %905 = vst [vmem:[%s1624_s29 + $0xe8] sm:$0xff] %v873_v21  ;;  %904 = vst [vmem:[%s1624_s29 + $0xe0] sm:$0xff] %v872_v32 }
 0x148   : > { %v744_v4 = vpop.permute.xlu1 %743  ;;  %v742_v40 = vpop.permute.xlu0 %741 }
 0x149   : > { %v875_v50 = vsel %vm843_vm2, %v842_v33, %v744_v4  ;;  %v874_v41 = vsel %vm843_vm2, %v841_v5, %v742_v40 }
 0x14a   : > { %907 = vst [vmem:[%s1624_s29 + $0xf8] sm:$0xff] %v875_v50  ;;  %906 = vst [vmem:[%s1624_s29 + $0xf0] sm:$0xff] %v874_v41 }
 0x14b   : > { %1096 = shalt.err (!%p1093_p3)
}
 0x14c   : > { %s1097_s13 = scalar_lea.hbm %s1765_s8, 4096  ;;  %s1101_s22 = scalar_lea.hbm %s1825_s4, 8192 }
 0x14d   : > { %p1098_p4 = scmp.ne.s32.totalorder %s1765_s8, %s1097_s13  ;;  %p1102_p9 = scmp.lt.s32.totalorder %s1765_s8, %s1825_s4 }
 0x14e   : > { %p1103_p10 = scmp.lt.s32.totalorder %s1101_s22, %s1097_s13 }
 0x14f   : > { %p1099_p7 = pnand %p1098_p4, %p1214_p5 }
 0x150   : > { %p1104_p11 = por %p1103_p10, %p1102_p9 }
 0x151   : > { %p1100_p8 = pneg %p1099_p7 }
 0x153   : > { %p1105_p12 = pnand %p1104_p11, %p1100_p8 }
 0x155   : > { %1108 = shalt.err (!%p1105_p12)
}
 0x156   : > { %s1149_s28 = smov 128   ;;  %s1150_s29 = smov 8  }
 0x157   : > { %1039 = dma.vmem_to_hbm [thread:$0]  (%p1214_p5), %s1767_s5, 4096, %s1765_s8, %s1781_s19, %s1149_s28, %s1149_s28, %s1150_s29  }
 0x158 PF: > { %p1045_p13 = scmp.ge.s32.totalorder %s1143_s18, 2  ;;  %s937_s30 = sand.u32 1, %s1131_s15  }
 0x159   : > { %s938_s6 = scalar_lea.sflag [#allocation3], %s937_s30 }
 0x15a   : > { %p1042_p0 = pnand %p1045_p13, %p1218_p6 }
 0x15c   : > { %p1043_p1 = pneg %p1042_p0 }
 0x15e   : > { %1126 = dma.done.wait (%p1043_p1), %s938_s6, 4096  }
 0x15f   : > { %1128 = vsyncadd (%p1043_p1), %s938_s6, 4294963200  ;;  %p14_p2 = scmp.ge.s32.totalorder %s1201_s21, 4   ;;  %s1840_s15 = smov %s1135_s16 }
 0x160   : > { %s1841_s16 = smov %s1139_s17  ;;  %s1842_s17 = smov %s1212_s24 }
 0x161   : > { %s1843_s18 = smov %s1201_s21  ;;  %16 = sbr.rel (!%p14_p2) target bundleno = 3 (0x3), region = 80 }
 0x166   :  { %943 = vsyncpa [#allocation3], 1 }
 0x167   :  { %945 = vsyncpa [#allocation3 + $0x1], 1 }

</bundles_post_ra>
